<compile_context>
chip_gen: v6e
topology: v6e:2x2x1
jax: 0.10.0
libtpu: 0.0.40
codegen_flags: <defaults>
</compile_context>

<pallas_src>
import functools

import jax
import jax.numpy as jnp
from jax.experimental import pallas as pl
from jax.experimental.pallas import tpu as pltpu


_OUT_PAD = 8   # fc2 out-dim 5 zero-padded to 8 columns; wrapper slices [:, :5]
_HIDDEN = 64
_NUM_OUT = 5


def _enn_kernel(x_ref, w1_ref, b1_ref, w2_ref, b2_ref, o_ref):
    # fc1 + ReLU   (x @ W1 + b1, W1 stored [in, out]); f32 accumulation on MXU.
    h1 = jnp.dot(x_ref[...], w1_ref[...], preferred_element_type=jnp.float32)
    h1 = jnp.maximum(h1 + b1_ref[...], 0.0)          # bias + ReLU kept in f32
    # fc2 (padded zero columns 5..7 stay zero; sliced off in the wrapper)
    out = jnp.dot(h1.astype(w2_ref.dtype), w2_ref[...],
                  preferred_element_type=jnp.float32)
    o_ref[...] = (out + b2_ref[...]).astype(o_ref.dtype)


def _round_up(x, m):
    return (x + m - 1) // m * m


def _cdiv(a, b):
    return -(-a // b)


def _vmem_caps():
    """(tile budget, vmem_limit_bytes) derived from this chip's physical VMEM.

    v5e/v6e: 128 MiB physical -> budget 32 MiB, limit 64 MiB.
    v7x:      64 MiB physical -> budget 16 MiB, limit 32 MiB (scoped default).
    """
    try:
        cap = int(pltpu.get_tpu_info().vmem_capacity_bytes)
    except Exception:
        cap = 64 << 20  # conservative fallback: v7x per-core physical VMEM
    budget = max(8 << 20, cap // 4)
    limit = min(max(budget + (8 << 20), cap // 2), cap - (4 << 20))
    return budget, limit


def _pick_block_batch(batch, num_ftrs, x_itemsize, w_itemsize, budget):
    """Largest power-of-two row tile (<=8192, multiple of 8) whose full VMEM
    footprint (double-buffered x/out tiles + double-buffered resident weights +
    f32 h1 intermediate) fits the per-generation budget.  Additionally capped at
    ~batch/2 so v7x's two TensorCores both get grid steps."""
    # Resident operands are still double-buffered by the pipeline by default.
    fixed = (2 * num_ftrs * _HIDDEN * w_itemsize      # W1
             + 2 * _HIDDEN * 4                        # b1 (f32)
             + 2 * _HIDDEN * _OUT_PAD * w_itemsize    # W2 (padded)
             + 2 * _OUT_PAD * 4)                      # b2 (f32, padded)
    tb = 8192
    while tb > 8:
        per_step = (2 * tb * num_ftrs * x_itemsize    # streamed x tile (x2 bufs)
                    + 2 * tb * _OUT_PAD * 4           # output tile (x2 bufs)
                    + tb * _HIDDEN * 4)               # h1 intermediate (f32)
        if fixed + per_step <= budget:
            break
        tb //= 2
    # >= 2 grid steps when the batch allows it (v7x megacore), and never larger
    # than the (8-rounded) batch itself.
    tb = min(tb, _round_up(max(_cdiv(batch, 2), 1), 8), _round_up(batch, 8))
    return max(tb, 8)


@functools.partial(jax.jit, static_argnames=("num_ftrs", "use_bf16"))
def enn_forward(x, params, *, num_ftrs, use_bf16=False):
    """Pallas implementation of ENN.forward: relu(x @ W1 + b1) @ W2 + b2."""
    w1, b1, w2, b2 = params
    hidden = w1.shape[1]    # 64
    num_out = w2.shape[1]   # 5

    # x.view(-1, num_ftrs)
    x2d = x.reshape(-1, num_ftrs)
    batch = x2d.shape[0]

    # Optional bf16 operands (halves the dominant x HBM stream; MXU-native on
    # v5e).  Biases and accumulation stay f32.
    if use_bf16:
        x2d = x2d.astype(jnp.bfloat16)
        w1 = w1.astype(jnp.bfloat16)
        w2 = w2.astype(jnp.bfloat16)

    budget, vmem_limit = _vmem_caps()
    tb = _pick_block_batch(batch, num_ftrs, x2d.dtype.itemsize,
                           w1.dtype.itemsize, budget)
    padded_b = _round_up(batch, tb)
    if padded_b != batch:
        x2d = jnp.pad(x2d, ((0, padded_b - batch), (0, 0)))

    # Pad fc2 out-dim (5) up to 8 zero columns (lane-layout friendly, tiny HBM
    # writeback vs the previous 128-wide padding).
    w2p = jnp.pad(w2, ((0, 0), (0, _OUT_PAD - num_out)))
    b2p = jnp.pad(b2, ((0, 0), (0, _OUT_PAD - num_out)))

    grid = (padded_b // tb,)
    const = lambda i: (0, 0)  # weights / biases stay VMEM-resident across steps

    flops = 2 * padded_b * (num_ftrs * hidden + hidden * _OUT_PAD)
    bytes_accessed = (
        padded_b * num_ftrs * x2d.dtype.itemsize
        + padded_b * _OUT_PAD * 4
        + num_ftrs * hidden * w1.dtype.itemsize
        + hidden * _OUT_PAD * w2p.dtype.itemsize
        + hidden * 4 + _OUT_PAD * 4
    )

    out = pl.pallas_call(
        _enn_kernel,
        out_shape=jax.ShapeDtypeStruct((padded_b, _OUT_PAD), jnp.float32),
        grid=grid,
        in_specs=[
            pl.BlockSpec((tb, num_ftrs), lambda i: (i, 0)),   # streamed x tile
            pl.BlockSpec((num_ftrs, hidden), const),          # W1 resident
            pl.BlockSpec((1, hidden), const),                 # b1 resident
            pl.BlockSpec((hidden, _OUT_PAD), const),          # W2 (padded) resident
            pl.BlockSpec((1, _OUT_PAD), const),               # b2 (padded) resident
        ],
        out_specs=pl.BlockSpec((tb, _OUT_PAD), lambda i: (i, 0)),
        compiler_params=pltpu.CompilerParams(
            dimension_semantics=("parallel",),
            vmem_limit_bytes=int(vmem_limit),
        ),
        cost_estimate=pl.CostEstimate(
            flops=flops, transcendentals=0, bytes_accessed=bytes_accessed
        ),
    )(x2d, w1, b1, w2p, b2p)

    # Drop batch padding and the 3 padded output columns.
    return out[:batch, :num_out]


def init_params(key, num_ftrs):
    """Deterministic synthetic params (nn.Linear shapes, stored [in, out])."""
    ks = jax.random.split(key, 4)
    w1 = jax.random.normal(ks[0], (num_ftrs, _HIDDEN), jnp.float32) * 0.05
    b1 = jax.random.normal(ks[1], (1, _HIDDEN), jnp.float32) * 0.01
    w2 = jax.random.normal(ks[2], (_HIDDEN, _NUM_OUT), jnp.float32) * 0.05
    b2 = jax.random.normal(ks[3], (1, _NUM_OUT), jnp.float32) * 0.01
    return (w1, b1, w2, b2)


def _reference(x, params, num_ftrs):
    w1, b1, w2, b2 = params
    x2d = x.reshape(-1, num_ftrs)
    h1 = jnp.maximum(x2d @ w1 + b1, 0.0)
    return h1 @ w2 + b2


if __name__ == "__main__":
    num_ftrs = 32
    key = jax.random.PRNGKey(0)
    k_x, k_p = jax.random.split(key)

    # (2, 4, 32) -> view(-1, 32) -> (8, 32), matching the module's flatten.
    x = jax.random.normal(k_x, (2, 4, num_ftrs), jnp.float32)
    params = init_params(k_p, num_ftrs)

    out = enn_forward(x, params, num_ftrs=num_ftrs)
    out = jax.block_until_ready(out)

    ref = _reference(x, params, num_ftrs)
    assert out.shape == (8, 5), out.shape
    assert jnp.allclose(out, ref, atol=1e-4, rtol=1e-4), "mismatch vs reference"

    print("KERNEL_OK")
</pallas_src>

<mosaic_0001>
module attributes {stable_mosaic.version = 11 : i64} {
  func.func @_enn_kernel(%arg0: i32, %arg1: memref<8x32xf32, #tpu.memory_space<vmem>>, %arg2: memref<32x64xf32, #tpu.memory_space<vmem>>, %arg3: memref<1x64xf32, #tpu.memory_space<vmem>>, %arg4: memref<64x8xf32, #tpu.memory_space<vmem>>, %arg5: memref<1x8xf32, #tpu.memory_space<vmem>>, %arg6: memref<8x8xf32, #tpu.memory_space<vmem>>) attributes {dimension_semantics = [#tpu.dimension_semantics<parallel>], iteration_bounds = array<i64: 1>, scalar_prefetch = 0 : i64, scratch_operands = 0 : i64, tpu.core_type = #tpu.core_type<tc>, window_params = [{transform_indices = @transform_0, window_bounds = array<i64: 8, 32>}, {pipeline_mode = #tpu.pipeline_mode<synchronous>, transform_indices = @transform_1, window_bounds = array<i64: 32, 64>}, {pipeline_mode = #tpu.pipeline_mode<synchronous>, transform_indices = @transform_2, window_bounds = array<i64: 1, 64>}, {pipeline_mode = #tpu.pipeline_mode<synchronous>, transform_indices = @transform_3, window_bounds = array<i64: 64, 8>}, {pipeline_mode = #tpu.pipeline_mode<synchronous>, transform_indices = @transform_4, window_bounds = array<i64: 1, 8>}, {transform_indices = @transform_5, window_bounds = array<i64: 8, 8>}]} {
    %c0 = arith.constant 0 : index
    %c0_0 = arith.constant 0 : index
    %0 = vector.load %arg1[%c0, %c0_0] : memref<8x32xf32, #tpu.memory_space<vmem>>, vector<8x32xf32>
    %c0_1 = arith.constant 0 : index
    %c0_2 = arith.constant 0 : index
    %1 = vector.load %arg2[%c0_1, %c0_2] : memref<32x64xf32, #tpu.memory_space<vmem>>, vector<32x64xf32>
    %cst = arith.constant dense<0.000000e+00> : vector<8x64xf32>
    %2 = tpu.matmul %0, %1, %cst {dimension_numbers = #tpu.dot_dimension_numbers<[1], [0], [0], [1], [0, 0, 1, 1], [], []>} : vector<8x32xf32>, vector<32x64xf32>, vector<8x64xf32> -> vector<8x64xf32>
    %c0_3 = arith.constant 0 : index
    %c0_4 = arith.constant 0 : index
    %3 = vector.load %arg3[%c0_3, %c0_4] : memref<1x64xf32, #tpu.memory_space<vmem>>, vector<1x64xf32>
    %4 = vector.broadcast %3 : vector<1x64xf32> to vector<8x64xf32>
    %5 = arith.addf %2, %4 : vector<8x64xf32>
    %cst_5 = arith.constant 0.000000e+00 : f32
    %6 = vector.broadcast %cst_5 : f32 to vector<8x64xf32>
    %7 = arith.maximumf %5, %6 : vector<8x64xf32>
    %c0_6 = arith.constant 0 : index
    %c0_7 = arith.constant 0 : index
    %8 = vector.load %arg4[%c0_6, %c0_7] : memref<64x8xf32, #tpu.memory_space<vmem>>, vector<64x8xf32>
    %cst_8 = arith.constant dense<0.000000e+00> : vector<8x8xf32>
    %9 = tpu.matmul %7, %8, %cst_8 {dimension_numbers = #tpu.dot_dimension_numbers<[1], [0], [0], [1], [0, 0, 1, 1], [], []>} : vector<8x64xf32>, vector<64x8xf32>, vector<8x8xf32> -> vector<8x8xf32>
    %c0_9 = arith.constant 0 : index
    %c0_10 = arith.constant 0 : index
    %10 = vector.load %arg5[%c0_9, %c0_10] : memref<1x8xf32, #tpu.memory_space<vmem>>, vector<1x8xf32>
    %11 = vector.broadcast %10 : vector<1x8xf32> to vector<8x8xf32>
    %12 = arith.addf %9, %11 : vector<8x8xf32>
    %c0_11 = arith.constant 0 : index
    %c0_12 = arith.constant 0 : index
    %13 = vector.load %arg6[%c0_11, %c0_12] : memref<8x8xf32, #tpu.memory_space<vmem>>, vector<8x8xf32>
    tpu.vector_store %arg6[%c0_11, %c0_12], %12 {strides = array<i32>} : memref<8x8xf32, #tpu.memory_space<vmem>>, vector<8x8xf32>,
    return
  }
  func.func @transform_0(%arg0: i32) -> (i32, i32) {
    %c0_i32 = arith.constant 0 : i32
    %c0_i32_0 = arith.constant 0 : i32
    return %arg0, %c0_i32 : i32, i32
  }
  func.func @transform_1(%arg0: i32) -> (i32, i32) {
    %c0_i32 = arith.constant 0 : i32
    %c0_i32_0 = arith.constant 0 : i32
    %c0_i32_1 = arith.constant 0 : i32
    return %c0_i32, %c0_i32_0 : i32, i32
  }
  func.func @transform_2(%arg0: i32) -> (i32, i32) {
    %c0_i32 = arith.constant 0 : i32
    %c0_i32_0 = arith.constant 0 : i32
    %c0_i32_1 = arith.constant 0 : i32
    return %c0_i32, %c0_i32_0 : i32, i32
  }
  func.func @transform_3(%arg0: i32) -> (i32, i32) {
    %c0_i32 = arith.constant 0 : i32
    %c0_i32_0 = arith.constant 0 : i32
    %c0_i32_1 = arith.constant 0 : i32
    return %c0_i32, %c0_i32_0 : i32, i32
  }
  func.func @transform_4(%arg0: i32) -> (i32, i32) {
    %c0_i32 = arith.constant 0 : i32
    %c0_i32_0 = arith.constant 0 : i32
    %c0_i32_1 = arith.constant 0 : i32
    return %c0_i32, %c0_i32_0 : i32, i32
  }
  func.func @transform_5(%arg0: i32) -> (i32, i32) {
    %c0_i32 = arith.constant 0 : i32
    %c0_i32_0 = arith.constant 0 : i32
    return %arg0, %c0_i32 : i32, i32
  }
}

</mosaic_0001>

<bundles_post_ra>
// kernel: enn_forward.1
= control target key start
LH: loop header
LB: loop body
LE: loop exit
PB: predicated region body
PF: predicated region fallthrough
CT: control target
= control target key end

     0   :  { %v286_v1 = vmov 0.0   ;;  %vm287_vm0 = vmmov 0   ;;  %s369_s0 = inlined_call_operand.vmem [shape: f32[8,32], index: 0, kind: input, shape index: {}]   ;;  %s370_s1 = inlined_call_operand.vmem [shape: f32[32,64], index: 1, kind: input, shape index: {}]   ;;  %s371_s2 = inlined_call_operand.vmem [shape: f32[1,64], index: 2, kind: input, shape index: {}]   ;;  %s372_s3 = inlined_call_operand.vmem [shape: f32[64,8], index: 3, kind: input, shape index: {}]   ;;  %s373_s4 = inlined_call_operand.vmem [shape: f32[1,8], index: 4, kind: input, shape index: {}]   ;;  %s374_s5 = inlined_call_operand.hbm [shape: f32[8,8], index: 5, kind: output, shape index: {}]  }
   0x1   :  { %v25_v0 = vld [vmem:[%s370_s1 + $0x18] sm:$0xff]  ;;  %231 = vmatprep.subr.mxu0 %v286_v1  ;;  %v24_v2 = vld [vmem:[%s370_s1 + $0x10] sm:$0xff]  ;;  %239 = vmatprep.mubr.msk.f32.mxu0 %vm287_vm0, %v286_v1  ;;  %v23_v5 = vld [vmem:[%s370_s1 + $0x8] sm:$0xff] }
   0x2   :  { %v115_v3 = vld [vmem:[%s372_s3 + $0x38] sm:$0xff]  ;;  %232 = vmatpush3.msra.mxu0 %v25_v0  ;;  %242 = vmatprep.subr.mxu1 %v286_v1  ;;  %v114_v4 = vld [vmem:[%s372_s3 + $0x30] sm:$0xff] }
   0x3   :  { %233 = vmatprep.subr.mxu0 %v286_v1  ;;  %243 = vmatpush3.msra.mxu1 %v115_v3 }
   0x4   :  { %10 = vsyncpa [#allocation3], 0  ;;  %234 = vmatpush3.msra.mxu0 %v24_v2  ;;  %244 = vmatprep.subr.mxu1 %v286_v1  ;;  %v113_v6 = vld [vmem:[%s372_s3 + $0x28] sm:$0xff]  ;;  %v22_v7 = vld [vmem:[%s370_s1] sm:$0xff]  ;;  %vm33_vm1 = vcmask 261120   ;;  %vm123_vm2 = vcmask 523264  }
   0x5   :  { %235 = vmatprep.subr.mxu0 %v286_v1  ;;  %245 = vmatpush3.msra.mxu1 %v114_v4  ;;  %v21_v8 = vld [vmem:[%s369_s0] sm:$0xff]  ;;  %v111_v10 = vld [vmem:[%s372_s3 + $0x18] sm:$0xff]  ;;  %v110_v11 = vld [vmem:[%s372_s3 + $0x10] sm:$0xff]  ;;  %s288_s21 = smov [#allocation2]   ;;  %vm197_vm3 = vcmask 64512  }
   0x6   :  { %236 = vmatpush3.msra.mxu0 %v23_v5  ;;  %246 = vmatprep.subr.mxu1 %v286_v1  ;;  %v112_v9 = vld [vmem:[%s372_s3 + $0x20] sm:$0xff]  ;;  %v109_v12 = vld [vmem:[%s372_s3 + $0x8] sm:$0xff]  ;;  %s205_s22 = sshll.u32 %s288_s21, 4  ;;  %s206_s22 = int_to_ptr.vmem [resolvable:$true] %s205_s22 }
   0x7   :  { %237 = vmatprep.subr.mxu0 %v286_v1  ;;  %247 = vmatpush3.msra.mxu1 %v113_v6  ;;  %v108_v13 = vld [vmem:[%s372_s3] sm:$0xff]  ;;  %s264_s3 = scalar_lea.vmem %s206_s22, 128  ;;  %p269_p1 = scmp.lt.s32.totalorder %s206_s22, %s206_s22 }
   0x8   :  { %238 = vmatpush3.msra.mxu0 %v22_v7  ;;  %248 = vmatprep.subr.mxu1 %v286_v1  ;;  %v213_v14 = vld [vmem:[%s371_s2] ss:$0 sm:$0xff]  ;;  %p265_p0 = scmp.ne.s32.totalorder %s206_s22, %s264_s3  ;;  %p270_p2 = scmp.lt.s32.totalorder %s264_s3, %s264_s3 }
   0x9   :  { %240 = vmatmul.mubr.msk.f32.vlgmr.msra.gmra.mxu0 %vm33_vm1, %v21_v8  ;;  %249 = vmatpush3.msra.mxu1 %v112_v9  ;;  %v215_v19 = vld [vmem:[%s373_s4] ss:$0 sm:$0xff] }
   0xa   :  { %250 = vmatprep.subr.mxu1 %v286_v1  ;;  %258 = vmatprep.mubr.msk.f32.mxu1 %vm287_vm0, %v286_v1  ;;  %p271_p3 = por %p270_p2, %p269_p1 }
   0xb   :  { %251 = vmatpush3.msra.mxu1 %v111_v10 }
   0xc   :  { %252 = vmatprep.subr.mxu1 %v286_v1  ;;  %p272_p4 = pnand %p271_p3, %p265_p0 }
   0xd   :  { %253 = vmatpush3.msra.mxu1 %v110_v11 }
   0xe   :  { %254 = vmatprep.subr.mxu1 %v286_v1 }
   0xf   :  { %255 = vmatpush3.msra.mxu1 %v109_v12 }
  0x10   :  { %256 = vmatprep.subr.mxu1 %v286_v1 }
  0x11   :  { %257 = vmatpush3.msra.mxu1 %v108_v13 }
  0xc9   :  { %v103_v15 = vpop.f32.mrf.mxu0 }
  0xca   :  { %v104_v16 = vadd.f32 %v213_v14, %v103_v15 }
  0xcb   :  { %v241_v17 = vpop.f32.mrf.mxu0 }
  0xcc   :  { %v107_v18 = vmax.f32 %v104_v16, 0.0 }
  0xce   :  { %259 = vmatmul.mubr.msk.f32.vlgmr.msra.gmra.mxu1 %vm123_vm2, %v107_v18 }
 0x18e   :  { %v193_v20 = vpop.f32.mrf.mxu1 }
 0x18f   :  { %v194_v21 = vadd.f32 %v215_v19, %v193_v20 }
 0x190   :  { %v260_v22 = vpop.f32.mrf.mxu1 }
 0x191   :  { %198 = vst.msk [vmem:[#allocation2] sm:$0xff] %vm197_vm3, %v194_v21 }
 0x192   :  { %275 = shalt.err (!%p272_p4)
}
 0x193   :  { %208 = dma.vmem_to_hbm [thread:$0]  %s206_s22, 128, %s374_s5, [#allocation3]  }
 0x194   :  { %284 = dma.done.wait [#allocation3], 128  }
 0x195   :  { %285 = vsyncadd [#allocation3], 4294967168 }
 0x196   :  { %212 = vsyncpa [#allocation3], 1 }

</bundles_post_ra>
